<compile_context>
chip_gen: v7x
topology: tpu7x:2x2x1
jax: 0.10.0
libtpu: 0.0.40
codegen_flags: <defaults>
</compile_context>

<pallas_src>
import jax
import jax.numpy as jnp
from jax.experimental import pallas as pl
from jax.experimental.pallas import tpu as pltpu

# ---- problem sizes (small, consistent with the trajectory model) ----
B, S, H = 2, 8, 32          # batch, sequence length, model width
BS = B * S                  # all rows processed in one matmul
FFN = 64                    # feed-forward width
N_LL, N_DAY, N_HOUR, N_CAT = 2, 7, 24, 10   # decoder head widths
N_TOTAL = N_LL + N_DAY + N_HOUR + N_CAT     # 43
HEAD_PAD = 128              # lane-dense output slab width


def _softmax(x):
    m = jnp.max(x, axis=-1, keepdims=True)
    e = jnp.exp(x - m)
    s = jnp.sum(e, axis=-1, keepdims=True)
    return e * pl.reciprocal(s, approx=True)


def generator_kernel(x_ref, amask_ref,
                     wqkv_ref, wo_ref, w1_ref, w2_ref, wheads_ref,
                     bias_ref,
                     out_ref):
    x = x_ref[...]                    # (BS, H)
    am = amask_ref[...]               # (BS, BS)  1.0 = attend allowed

    # ----------- encoder: fused-QKV masked self-attention (block-diag) -----------
    qkv = jnp.dot(x, wqkv_ref[...], preferred_element_type=jnp.float32)  # (BS, 3H)
    q = qkv[:, 0:H]
    k = qkv[:, H:2 * H]
    v = qkv[:, 2 * H:3 * H]

    # scores[i, j] = q[i] . k[j]  (contract hidden dim, no transpose copy)
    scores = jax.lax.dot_general(q, k, (((1,), (1,)), ((), ())),
                                 preferred_element_type=jnp.float32)
    scores = scores * (1.0 / jnp.sqrt(jnp.float32(H)))
    scores = jnp.where(am > 0.5, scores, jnp.float32(-1e9))  # mask keys + cross-batch
    p = _softmax(scores)
    attn = jnp.dot(p, v, preferred_element_type=jnp.float32)
    h1 = x + jnp.dot(attn, wo_ref[...], preferred_element_type=jnp.float32)

    # ----------- encoder: feed-forward + residual + layernorm -----------
    b1 = bias_ref[0:1, 0:FFN]        # (1, FFN)
    b2 = bias_ref[1:2, 0:H]          # (1, H)
    gamma = bias_ref[2:3, 0:H]       # (1, H)
    beta = bias_ref[3:4, 0:H]        # (1, H)
    bhead = bias_ref[4:5, :]         # (1, HEAD_PAD), padded with zeros

    f = jnp.maximum(
        jnp.dot(h1, w1_ref[...], preferred_element_type=jnp.float32) + b1, 0.0)
    f = jnp.dot(f, w2_ref[...], preferred_element_type=jnp.float32) + b2
    h2 = h1 + f
    mu = jnp.mean(h2, axis=-1, keepdims=True)
    var = jnp.mean((h2 - mu) ** 2, axis=-1, keepdims=True)
    h = (h2 - mu) * jax.lax.rsqrt(var + 1e-5) * gamma + beta

    # ----------- decoder: four heads fused into one lane-dense matmul -----------
    logits = jnp.dot(h, wheads_ref[...],
                     preferred_element_type=jnp.float32) + bhead   # (BS, HEAD_PAD)
    o_ll = jnp.tanh(logits[:, 0:N_LL])
    o_day = _softmax(logits[:, N_LL:N_LL + N_DAY])
    o_hour = _softmax(logits[:, N_LL + N_DAY:N_LL + N_DAY + N_HOUR])
    o_cat = _softmax(logits[:, N_LL + N_DAY + N_HOUR:N_TOTAL])
    pad = jnp.zeros((BS, HEAD_PAD - N_TOTAL), jnp.float32)
    # single dense (BS, 128) store -> one lane-dense output DMA
    out_ref[...] = jnp.concatenate([o_ll, o_day, o_hour, o_cat, pad], axis=-1)


def generator_forward(x, mask, params):
    """x: [B,S,H] f32, mask: [B,S] {0,1} f32, params: flat list (see main)."""
    (wq, wk, wv, wo, w1, b1, w2, b2, gamma, beta,
     wll, bll, wd, bd, wh, bh, wc, bc) = params

    # ---- layout plumbing (outside the kernel, trivially cheap) ----
    xf = x.reshape(BS, H).astype(jnp.float32)

    # block-diagonal attention mask: same batch AND key position valid
    batch_ids = jnp.repeat(jnp.arange(B), S)                       # (BS,)
    same_batch = batch_ids[:, None] == batch_ids[None, :]          # (BS, BS)
    key_valid = mask.reshape(BS) > 0.5                             # (BS,)
    amask = (same_batch & key_valid[None, :]).astype(jnp.float32)  # (BS, BS)

    wqkv = jnp.concatenate([wq, wk, wv], axis=1)                   # (H, 3H)
    wheads = jnp.concatenate([wll, wd, wh, wc], axis=1)            # (H, 43)
    wheads = jnp.pad(wheads, ((0, 0), (0, HEAD_PAD - N_TOTAL)))    # (H, 128)

    bheads = jnp.concatenate([bll, bd, bh, bc], axis=1)[0]         # (43,)
    biases = jnp.zeros((8, 128), jnp.float32)
    biases = biases.at[0, :FFN].set(b1[0])
    biases = biases.at[1, :H].set(b2[0])
    biases = biases.at[2, :H].set(gamma[0])
    biases = biases.at[3, :H].set(beta[0])
    biases = biases.at[4, :N_TOTAL].set(bheads)

    def full(shape):
        n = len(shape)
        return pl.BlockSpec(shape, lambda i, _n=n: (0,) * _n)

    in_specs = [
        full((BS, H)),            # x (flattened batch)
        full((BS, BS)),           # attention mask
        full((H, 3 * H)),         # fused Wqkv
        full((H, H)),             # Wo
        full((H, FFN)),           # W1
        full((FFN, H)),           # W2
        full((H, HEAD_PAD)),      # fused head weights (padded)
        full((8, 128)),           # packed biases / LN params
    ]
    out_spec = pl.BlockSpec((BS, HEAD_PAD), lambda i: (0, 0))
    out_shape = jax.ShapeDtypeStruct((BS, HEAD_PAD), jnp.float32)

    out = pl.pallas_call(
        generator_kernel,
        out_shape=out_shape,
        grid_spec=pltpu.PrefetchScalarGridSpec(
            num_scalar_prefetch=0,
            grid=(1,),                      # single invocation: whole batch at once
            in_specs=in_specs,
            out_specs=out_spec,
        ),
        compiler_params=pltpu.CompilerParams(
            dimension_semantics=("arbitrary",)),
    )(xf, amask, wqkv, wo, w1, w2, wheads, biases)

    out = out.reshape(B, S, HEAD_PAD)
    lat_lon = out[..., 0:N_LL]
    day = out[..., N_LL:N_LL + N_DAY]
    hour = out[..., N_LL + N_DAY:N_LL + N_DAY + N_HOUR]
    category = out[..., N_LL + N_DAY + N_HOUR:N_TOTAL]
    return lat_lon, day, hour, category


if __name__ == "__main__":
    key = jax.random.PRNGKey(0)
    keys = jax.random.split(key, 16)

    def w(k, shape, scale=0.1):
        return (scale * jax.random.normal(k, shape)).astype(jnp.float32)

    params = [
        w(keys[0], (H, H)), w(keys[1], (H, H)),                       # Wq, Wk
        w(keys[2], (H, H)), w(keys[3], (H, H)),                       # Wv, Wo
        w(keys[4], (H, FFN)), jnp.zeros((1, FFN), jnp.float32),       # W1, b1
        w(keys[5], (FFN, H)), jnp.zeros((1, H), jnp.float32),         # W2, b2
        jnp.ones((1, H), jnp.float32), jnp.zeros((1, H), jnp.float32),  # LN
        w(keys[6], (H, N_LL)), jnp.zeros((1, N_LL), jnp.float32),
        w(keys[7], (H, N_DAY)), jnp.zeros((1, N_DAY), jnp.float32),
        w(keys[8], (H, N_HOUR)), jnp.zeros((1, N_HOUR), jnp.float32),
        w(keys[9], (H, N_CAT)), jnp.zeros((1, N_CAT), jnp.float32),
    ]

    x = jax.random.normal(keys[10], (B, S, H), jnp.float32)
    lengths = jnp.array([S, S - 3])                       # variable-length sequences
    mask = (jnp.arange(S)[None, :] < lengths[:, None]).astype(jnp.float32)  # (B, S)

    lat_lon, day, hour, category = generator_forward(x, mask, params)
    jax.block_until_ready((lat_lon, day, hour, category))

    assert lat_lon.shape == (B, S, N_LL)
    assert day.shape == (B, S, N_DAY)
    assert hour.shape == (B, S, N_HOUR)
    assert category.shape == (B, S, N_CAT)
    print("KERNEL_OK")
</pallas_src>

<mosaic_0001>
module attributes {stable_mosaic.version = 11 : i64} {
  func.func @generator_kernel(%arg0: i32, %arg1: memref<16x32xf32, #tpu.memory_space<vmem>>, %arg2: memref<16x16xf32, #tpu.memory_space<vmem>>, %arg3: memref<32x96xf32, #tpu.memory_space<vmem>>, %arg4: memref<32x32xf32, #tpu.memory_space<vmem>>, %arg5: memref<32x64xf32, #tpu.memory_space<vmem>>, %arg6: memref<64x32xf32, #tpu.memory_space<vmem>>, %arg7: memref<32x128xf32, #tpu.memory_space<vmem>>, %arg8: memref<8x128xf32, #tpu.memory_space<vmem>>, %arg9: memref<16x128xf32, #tpu.memory_space<vmem>>) attributes {dimension_semantics = [#tpu.dimension_semantics<arbitrary>], iteration_bounds = array<i64: 1>, scalar_prefetch = 0 : i64, scratch_operands = 0 : i64, tpu.core_type = #tpu.core_type<tc>, window_params = [{pipeline_mode = #tpu.pipeline_mode<synchronous>, transform_indices = @transform_0, window_bounds = array<i64: 16, 32>}, {pipeline_mode = #tpu.pipeline_mode<synchronous>, transform_indices = @transform_1, window_bounds = array<i64: 16, 16>}, {pipeline_mode = #tpu.pipeline_mode<synchronous>, transform_indices = @transform_2, window_bounds = array<i64: 32, 96>}, {pipeline_mode = #tpu.pipeline_mode<synchronous>, transform_indices = @transform_3, window_bounds = array<i64: 32, 32>}, {pipeline_mode = #tpu.pipeline_mode<synchronous>, transform_indices = @transform_4, window_bounds = array<i64: 32, 64>}, {pipeline_mode = #tpu.pipeline_mode<synchronous>, transform_indices = @transform_5, window_bounds = array<i64: 64, 32>}, {pipeline_mode = #tpu.pipeline_mode<synchronous>, transform_indices = @transform_6, window_bounds = array<i64: 32, 128>}, {pipeline_mode = #tpu.pipeline_mode<synchronous>, transform_indices = @transform_7, window_bounds = array<i64: 8, 128>}, {pipeline_mode = #tpu.pipeline_mode<synchronous>, transform_indices = @transform_8, window_bounds = array<i64: 16, 128>}]} {
    %c0 = arith.constant 0 : index
    %c0_0 = arith.constant 0 : index
    %0 = vector.load %arg1[%c0, %c0_0] : memref<16x32xf32, #tpu.memory_space<vmem>>, vector<16x32xf32>
    %c0_1 = arith.constant 0 : index
    %c0_2 = arith.constant 0 : index
    %1 = vector.load %arg2[%c0_1, %c0_2] : memref<16x16xf32, #tpu.memory_space<vmem>>, vector<16x16xf32>
    %c0_3 = arith.constant 0 : index
    %c0_4 = arith.constant 0 : index
    %2 = vector.load %arg3[%c0_3, %c0_4] : memref<32x96xf32, #tpu.memory_space<vmem>>, vector<32x96xf32>
    %cst = arith.constant dense<0.000000e+00> : vector<16x96xf32>
    %3 = tpu.matmul %0, %2, %cst {dimension_numbers = #tpu.dot_dimension_numbers<[1], [0], [0], [1], [0, 0, 1, 1], [], []>} : vector<16x32xf32>, vector<32x96xf32>, vector<16x96xf32> -> vector<16x96xf32>
    %4 = vector.extract_strided_slice %3 {offsets = [0, 0], sizes = [16, 32], strides = [1, 1]} : vector<16x96xf32> to vector<16x32xf32>
    %5 = vector.extract_strided_slice %3 {offsets = [0, 32], sizes = [16, 32], strides = [1, 1]} : vector<16x96xf32> to vector<16x32xf32>
    %6 = vector.extract_strided_slice %3 {offsets = [0, 64], sizes = [16, 32], strides = [1, 1]} : vector<16x96xf32> to vector<16x32xf32>
    %cst_5 = arith.constant dense<0.000000e+00> : vector<16x16xf32>
    %7 = tpu.matmul %4, %5, %cst_5 {dimension_numbers = #tpu.dot_dimension_numbers<[1], [1], [0], [0], [0, 0, 1, 0], [], []>} : vector<16x32xf32>, vector<16x32xf32>, vector<16x16xf32> -> vector<16x16xf32>
    %cst_6 = arith.constant 3.200000e+01 : f32
    %8 = math.sqrt %cst_6 : f32
    %cst_7 = arith.constant 1.000000e+00 : f32
    %9 = arith.divf %cst_7, %8 : f32
    %10 = vector.broadcast %9 : f32 to vector<16x16xf32>
    %11 = arith.mulf %7, %10 : vector<16x16xf32>
    %cst_8 = arith.constant 5.000000e-01 : f32
    %12 = vector.broadcast %cst_8 : f32 to vector<16x16xf32>
    %13 = arith.cmpf ogt, %1, %12 : vector<16x16xf32>
    %cst_9 = arith.constant -1.000000e+09 : f32
    %14 = vector.broadcast %cst_9 : f32 to vector<16x16xf32>
    %15 = arith.select %13, %11, %14 : vector<16x16xi1>, vector<16x16xf32>
    %cst_10 = arith.constant dense<0xFF800000> : vector<16xf32>
    %16 = vector.multi_reduction <maximumf>, %15, %cst_10 [1] : vector<16x16xf32> to vector<16xf32>
    %17 = vector.shape_cast %16 : vector<16xf32> to vector<16x1xf32>
    %18 = vector.broadcast %17 : vector<16x1xf32> to vector<16x16xf32>
    %19 = arith.subf %15, %18 : vector<16x16xf32>
    %20 = math.exp %19 : vector<16x16xf32>
    %cst_11 = arith.constant dense<0.000000e+00> : vector<16xf32>
    %21 = vector.multi_reduction <add>, %20, %cst_11 [1] : vector<16x16xf32> to vector<16xf32>
    %22 = vector.shape_cast %21 : vector<16xf32> to vector<16x1xf32>
    %23 = tpu.reciprocal %22 {approx = true} : vector<16x1xf32> -> vector<16x1xf32>
    %24 = vector.broadcast %23 : vector<16x1xf32> to vector<16x16xf32>
    %25 = arith.mulf %20, %24 : vector<16x16xf32>
    %cst_12 = arith.constant dense<0.000000e+00> : vector<16x32xf32>
    %26 = tpu.matmul %25, %6, %cst_12 {dimension_numbers = #tpu.dot_dimension_numbers<[1], [0], [0], [1], [0, 0, 1, 1], [], []>} : vector<16x16xf32>, vector<16x32xf32>, vector<16x32xf32> -> vector<16x32xf32>
    %c0_13 = arith.constant 0 : index
    %c0_14 = arith.constant 0 : index
    %27 = vector.load %arg4[%c0_13, %c0_14] : memref<32x32xf32, #tpu.memory_space<vmem>>, vector<32x32xf32>
    %cst_15 = arith.constant dense<0.000000e+00> : vector<16x32xf32>
    %28 = tpu.matmul %26, %27, %cst_15 {dimension_numbers = #tpu.dot_dimension_numbers<[1], [0], [0], [1], [0, 0, 1, 1], [], []>} : vector<16x32xf32>, vector<32x32xf32>, vector<16x32xf32> -> vector<16x32xf32>
    %29 = arith.addf %0, %28 : vector<16x32xf32>
    %c0_16 = arith.constant 0 : index
    %c0_17 = arith.constant 0 : index
    %30 = vector.load %arg8[%c0_16, %c0_17] : memref<8x128xf32, #tpu.memory_space<vmem>>, vector<1x64xf32>
    %c1 = arith.constant 1 : index
    %c0_18 = arith.constant 0 : index
    %31 = vector.load %arg8[%c1, %c0_18] : memref<8x128xf32, #tpu.memory_space<vmem>>, vector<1x32xf32>
    %c2 = arith.constant 2 : index
    %c0_19 = arith.constant 0 : index
    %32 = vector.load %arg8[%c2, %c0_19] : memref<8x128xf32, #tpu.memory_space<vmem>>, vector<1x32xf32>
    %c3 = arith.constant 3 : index
    %c0_20 = arith.constant 0 : index
    %33 = vector.load %arg8[%c3, %c0_20] : memref<8x128xf32, #tpu.memory_space<vmem>>, vector<1x32xf32>
    %c4 = arith.constant 4 : index
    %c0_21 = arith.constant 0 : index
    %34 = vector.load %arg8[%c4, %c0_21] : memref<8x128xf32, #tpu.memory_space<vmem>>, vector<1x128xf32>
    %c0_22 = arith.constant 0 : index
    %c0_23 = arith.constant 0 : index
    %35 = vector.load %arg5[%c0_22, %c0_23] : memref<32x64xf32, #tpu.memory_space<vmem>>, vector<32x64xf32>
    %cst_24 = arith.constant dense<0.000000e+00> : vector<16x64xf32>
    %36 = tpu.matmul %29, %35, %cst_24 {dimension_numbers = #tpu.dot_dimension_numbers<[1], [0], [0], [1], [0, 0, 1, 1], [], []>} : vector<16x32xf32>, vector<32x64xf32>, vector<16x64xf32> -> vector<16x64xf32>
    %37 = vector.broadcast %30 : vector<1x64xf32> to vector<16x64xf32>
    %38 = arith.addf %36, %37 : vector<16x64xf32>
    %cst_25 = arith.constant 0.000000e+00 : f32
    %39 = vector.broadcast %cst_25 : f32 to vector<16x64xf32>
    %40 = arith.maximumf %38, %39 : vector<16x64xf32>
    %c0_26 = arith.constant 0 : index
    %c0_27 = arith.constant 0 : index
    %41 = vector.load %arg6[%c0_26, %c0_27] : memref<64x32xf32, #tpu.memory_space<vmem>>, vector<64x32xf32>
    %cst_28 = arith.constant dense<0.000000e+00> : vector<16x32xf32>
    %42 = tpu.matmul %40, %41, %cst_28 {dimension_numbers = #tpu.dot_dimension_numbers<[1], [0], [0], [1], [0, 0, 1, 1], [], []>} : vector<16x64xf32>, vector<64x32xf32>, vector<16x32xf32> -> vector<16x32xf32>
    %43 = vector.broadcast %31 : vector<1x32xf32> to vector<16x32xf32>
    %44 = arith.addf %42, %43 : vector<16x32xf32>
    %45 = arith.addf %29, %44 : vector<16x32xf32>
    %cst_29 = arith.constant dense<0.000000e+00> : vector<16xf32>
    %46 = vector.multi_reduction <add>, %45, %cst_29 [1] : vector<16x32xf32> to vector<16xf32>
    %47 = vector.shape_cast %46 : vector<16xf32> to vector<16x1xf32>
    %cst_30 = arith.constant 3.200000e+01 : f32
    %48 = vector.broadcast %cst_30 : f32 to vector<16x1xf32>
    %49 = arith.divf %47, %48 : vector<16x1xf32>
    %50 = vector.broadcast %49 : vector<16x1xf32> to vector<16x32xf32>
    %51 = arith.subf %45, %50 : vector<16x32xf32>
    %52 = arith.mulf %51, %51 : vector<16x32xf32>
    %cst_31 = arith.constant dense<0.000000e+00> : vector<16xf32>
    %53 = vector.multi_reduction <add>, %52, %cst_31 [1] : vector<16x32xf32> to vector<16xf32>
    %54 = vector.shape_cast %53 : vector<16xf32> to vector<16x1xf32>
    %cst_32 = arith.constant 3.200000e+01 : f32
    %55 = vector.broadcast %cst_32 : f32 to vector<16x1xf32>
    %56 = arith.divf %54, %55 : vector<16x1xf32>
    %57 = vector.broadcast %49 : vector<16x1xf32> to vector<16x32xf32>
    %58 = arith.subf %45, %57 : vector<16x32xf32>
    %cst_33 = arith.constant 9.99999974E-6 : f32
    %59 = vector.broadcast %cst_33 : f32 to vector<16x1xf32>
    %60 = arith.addf %56, %59 : vector<16x1xf32>
    %61 = math.rsqrt %60 : vector<16x1xf32>
    %62 = vector.broadcast %61 : vector<16x1xf32> to vector<16x32xf32>
    %63 = arith.mulf %58, %62 : vector<16x32xf32>
    %64 = vector.broadcast %32 : vector<1x32xf32> to vector<16x32xf32>
    %65 = arith.mulf %63, %64 : vector<16x32xf32>
    %66 = vector.broadcast %33 : vector<1x32xf32> to vector<16x32xf32>
    %67 = arith.addf %65, %66 : vector<16x32xf32>
    %c0_34 = arith.constant 0 : index
    %c0_35 = arith.constant 0 : index
    %68 = vector.load %arg7[%c0_34, %c0_35] : memref<32x128xf32, #tpu.memory_space<vmem>>, vector<32x128xf32>
    %cst_36 = arith.constant dense<0.000000e+00> : vector<16x128xf32>
    %69 = tpu.matmul %67, %68, %cst_36 {dimension_numbers = #tpu.dot_dimension_numbers<[1], [0], [0], [1], [0, 0, 1, 1], [], []>} : vector<16x32xf32>, vector<32x128xf32>, vector<16x128xf32> -> vector<16x128xf32>
    %70 = vector.broadcast %34 : vector<1x128xf32> to vector<16x128xf32>
    %71 = arith.addf %69, %70 : vector<16x128xf32>
    %72 = vector.extract_strided_slice %71 {offsets = [0, 0], sizes = [16, 2], strides = [1, 1]} : vector<16x128xf32> to vector<16x2xf32>
    %73 = math.tanh %72 : vector<16x2xf32>
    %74 = vector.extract_strided_slice %71 {offsets = [0, 2], sizes = [16, 7], strides = [1, 1]} : vector<16x128xf32> to vector<16x7xf32>
    %cst_37 = arith.constant dense<0xFF800000> : vector<16xf32>
    %75 = vector.multi_reduction <maximumf>, %74, %cst_37 [1] : vector<16x7xf32> to vector<16xf32>
    %76 = vector.shape_cast %75 : vector<16xf32> to vector<16x1xf32>
    %77 = vector.broadcast %76 : vector<16x1xf32> to vector<16x7xf32>
    %78 = arith.subf %74, %77 : vector<16x7xf32>
    %79 = math.exp %78 : vector<16x7xf32>
    %cst_38 = arith.constant dense<0.000000e+00> : vector<16xf32>
    %80 = vector.multi_reduction <add>, %79, %cst_38 [1] : vector<16x7xf32> to vector<16xf32>
    %81 = vector.shape_cast %80 : vector<16xf32> to vector<16x1xf32>
    %82 = tpu.reciprocal %81 {approx = true} : vector<16x1xf32> -> vector<16x1xf32>
    %83 = vector.broadcast %82 : vector<16x1xf32> to vector<16x7xf32>
    %84 = arith.mulf %79, %83 : vector<16x7xf32>
    %85 = vector.extract_strided_slice %71 {offsets = [0, 9], sizes = [16, 24], strides = [1, 1]} : vector<16x128xf32> to vector<16x24xf32>
    %cst_39 = arith.constant dense<0xFF800000> : vector<16xf32>
    %86 = vector.multi_reduction <maximumf>, %85, %cst_39 [1] : vector<16x24xf32> to vector<16xf32>
    %87 = vector.shape_cast %86 : vector<16xf32> to vector<16x1xf32>
    %88 = vector.broadcast %87 : vector<16x1xf32> to vector<16x24xf32>
    %89 = arith.subf %85, %88 : vector<16x24xf32>
    %90 = math.exp %89 : vector<16x24xf32>
    %cst_40 = arith.constant dense<0.000000e+00> : vector<16xf32>
    %91 = vector.multi_reduction <add>, %90, %cst_40 [1] : vector<16x24xf32> to vector<16xf32>
    %92 = vector.shape_cast %91 : vector<16xf32> to vector<16x1xf32>
    %93 = tpu.reciprocal %92 {approx = true} : vector<16x1xf32> -> vector<16x1xf32>
    %94 = vector.broadcast %93 : vector<16x1xf32> to vector<16x24xf32>
    %95 = arith.mulf %90, %94 : vector<16x24xf32>
    %96 = vector.extract_strided_slice %71 {offsets = [0, 33], sizes = [16, 10], strides = [1, 1]} : vector<16x128xf32> to vector<16x10xf32>
    %cst_41 = arith.constant dense<0xFF800000> : vector<16xf32>
    %97 = vector.multi_reduction <maximumf>, %96, %cst_41 [1] : vector<16x10xf32> to vector<16xf32>
    %98 = vector.shape_cast %97 : vector<16xf32> to vector<16x1xf32>
    %99 = vector.broadcast %98 : vector<16x1xf32> to vector<16x10xf32>
    %100 = arith.subf %96, %99 : vector<16x10xf32>
    %101 = math.exp %100 : vector<16x10xf32>
    %cst_42 = arith.constant dense<0.000000e+00> : vector<16xf32>
    %102 = vector.multi_reduction <add>, %101, %cst_42 [1] : vector<16x10xf32> to vector<16xf32>
    %103 = vector.shape_cast %102 : vector<16xf32> to vector<16x1xf32>
    %104 = tpu.reciprocal %103 {approx = true} : vector<16x1xf32> -> vector<16x1xf32>
    %105 = vector.broadcast %104 : vector<16x1xf32> to vector<16x10xf32>
    %106 = arith.mulf %101, %105 : vector<16x10xf32>
    %cst_43 = arith.constant 0.000000e+00 : f32
    %107 = vector.broadcast %cst_43 : f32 to vector<16x85xf32>
    %108 = tpu.concatenate %73, %84, %95, %106, %107 in 1 : vector<16x2xf32>, vector<16x7xf32>, vector<16x24xf32>, vector<16x10xf32>, vector<16x85xf32> -> vector<16x128xf32>
    %c0_44 = arith.constant 0 : index
    %c0_45 = arith.constant 0 : index
    %109 = vector.load %arg9[%c0_44, %c0_45] : memref<16x128xf32, #tpu.memory_space<vmem>>, vector<16x128xf32>
    tpu.vector_store %arg9[%c0_44, %c0_45], %108 {strides = array<i32>} : memref<16x128xf32, #tpu.memory_space<vmem>>, vector<16x128xf32>,
    return
  }
  func.func @transform_0(%arg0: i32) -> (i32, i32) {
    %c0_i32 = arith.constant 0 : i32
    %c0_i32_0 = arith.constant 0 : i32
    %c0_i32_1 = arith.constant 0 : i32
    return %c0_i32, %c0_i32_0 : i32, i32
  }
  func.func @transform_1(%arg0: i32) -> (i32, i32) {
    %c0_i32 = arith.constant 0 : i32
    %c0_i32_0 = arith.constant 0 : i32
    %c0_i32_1 = arith.constant 0 : i32
    return %c0_i32, %c0_i32_0 : i32, i32
  }
  func.func @transform_2(%arg0: i32) -> (i32, i32) {
    %c0_i32 = arith.constant 0 : i32
    %c0_i32_0 = arith.constant 0 : i32
    %c0_i32_1 = arith.constant 0 : i32
    return %c0_i32, %c0_i32_0 : i32, i32
  }
  func.func @transform_3(%arg0: i32) -> (i32, i32) {
    %c0_i32 = arith.constant 0 : i32
    %c0_i32_0 = arith.constant 0 : i32
    %c0_i32_1 = arith.constant 0 : i32
    return %c0_i32, %c0_i32_0 : i32, i32
  }
  func.func @transform_4(%arg0: i32) -> (i32, i32) {
    %c0_i32 = arith.constant 0 : i32
    %c0_i32_0 = arith.constant 0 : i32
    %c0_i32_1 = arith.constant 0 : i32
    return %c0_i32, %c0_i32_0 : i32, i32
  }
  func.func @transform_5(%arg0: i32) -> (i32, i32) {
    %c0_i32 = arith.constant 0 : i32
    %c0_i32_0 = arith.constant 0 : i32
    %c0_i32_1 = arith.constant 0 : i32
    return %c0_i32, %c0_i32_0 : i32, i32
  }
  func.func @transform_6(%arg0: i32) -> (i32, i32) {
    %c0_i32 = arith.constant 0 : i32
    %c0_i32_0 = arith.constant 0 : i32
    %c0_i32_1 = arith.constant 0 : i32
    return %c0_i32, %c0_i32_0 : i32, i32
  }
  func.func @transform_7(%arg0: i32) -> (i32, i32) {
    %c0_i32 = arith.constant 0 : i32
    %c0_i32_0 = arith.constant 0 : i32
    %c0_i32_1 = arith.constant 0 : i32
    return %c0_i32, %c0_i32_0 : i32, i32
  }
  func.func @transform_8(%arg0: i32) -> (i32, i32) {
    %c0_i32 = arith.constant 0 : i32
    %c0_i32_0 = arith.constant 0 : i32
    %c0_i32_1 = arith.constant 0 : i32
    return %c0_i32, %c0_i32_0 : i32, i32
  }
}

</mosaic_0001>

<bundles_post_ra>
// kernel: tpu_custom_call.1
= control target key start
LH: loop header
LB: loop body
LE: loop exit
PB: predicated region body
PF: predicated region fallthrough
CT: control target
= control target key end

     0   :  { %13 = vsyncpa [#allocation3], 0  ;;  %s1510_s0 = inlined_call_operand.hbm [shape: f32[16,32], index: 0, kind: input, shape index: {}]   ;;  %s1511_s1 = inlined_call_operand.hbm [shape: f32[16,16], index: 1, kind: input, shape index: {}]   ;;  %s1512_s2 = inlined_call_operand.vmem [shape: f32[32,96], index: 2, kind: input, shape index: {}]   ;;  %s1513_s3 = inlined_call_operand.vmem [shape: f32[32,32], index: 3, kind: input, shape index: {}]   ;;  %s1514_s4 = inlined_call_operand.vmem [shape: f32[32,64], index: 4, kind: input, shape index: {}]   ;;  %s1515_s5 = inlined_call_operand.vmem [shape: f32[64,32], index: 5, kind: input, shape index: {}]   ;;  %s1516_s6 = inlined_call_operand.hbm [shape: f32[32,128], index: 6, kind: input, shape index: {}]   ;;  %s1517_s7 = inlined_call_operand.vmem [shape: f32[8,128], index: 7, kind: input, shape index: {}]   ;;  %s1518_s8 = inlined_call_operand.hbm [shape: f32[16,128], index: 8, kind: output, shape index: {}]  }
   0x1   :  { %14 = vsyncpa [#allocation6], 0 }
   0x2   :  { %15 = vsyncpa [#allocation4], 0  ;;  %s1256_s27 = smov [#allocation5]   ;;  %s1257_s29 = smov [#allocation2]  }
   0x3   :  { %s33_s28 = sshll.u32 %s1256_s27, 4  ;;  %s21_s30 = sshll.u32 %s1257_s29, 4  ;;  %s34_s28 = int_to_ptr.vmem [resolvable:$true] %s33_s28  ;;  %s1312_s30 = int_to_ptr.vmem [resolvable:$true] %s21_s30 }
   0x4   :  { %s1162_s11 = scalar_lea.hbm %s1511_s1, 256 }
   0x5   :  { %p1163_p0 = scmp.ne.s32.totalorder %s1511_s1, %s1162_s11  ;;  %p1166_p1 = scmp.lt.u32.totalorder %s1162_s11, %s1511_s1 }
   0x7   :  { %p1168_p2 = pnand %p1166_p1, %p1163_p0 }
   0x9   :  { %1171 = shalt.err (!%p1168_p2)
}
   0xa   :  { %s1172_s16 = scalar_lea.vmem %s34_s28, 256  ;;  %p1177_p4 = scmp.lt.s32.totalorder %s34_s28, %s34_s28 }
   0xb   :  { %p1173_p3 = scmp.ne.s32.totalorder %s34_s28, %s1172_s16  ;;  %p1178_p5 = scmp.lt.s32.totalorder %s1172_s16, %s1172_s16 }
   0xd   :  { %p1179_p6 = por %p1178_p5, %p1177_p4 }
   0xf   :  { %p1180_p7 = pnand %p1179_p6, %p1173_p3 }
  0x11   :  { %1183 = shalt.err (!%p1180_p7)
}
  0x12   :  { %s1258_s17 = smov 128   ;;  %s1259_s18 = smov 8  }
  0x13   :  { %39 = dma.hbm_to_vmem [thread:$0]  %s1511_s1, 256, %s34_s28, [#allocation6], %s1258_s17, %s1258_s17, %s1259_s18  }
  0x14   :  { %s1184_s23 = scalar_lea.hbm %s1510_s0, 256 }
  0x15   :  { %p1185_p8 = scmp.ne.s32.totalorder %s1510_s0, %s1184_s23  ;;  %p1188_p9 = scmp.lt.u32.totalorder %s1184_s23, %s1510_s0 }
  0x17   :  { %p1190_p10 = pnand %p1188_p9, %p1185_p8 }
  0x19   :  { %1193 = shalt.err (!%p1190_p10)
}
  0x1a   :  { %s1194_s29 = scalar_lea.vmem %s1312_s30, 256  ;;  %p1199_p12 = scmp.lt.s32.totalorder %s1312_s30, %s1312_s30 }
  0x1b   :  { %p1195_p11 = scmp.ne.s32.totalorder %s1312_s30, %s1194_s29  ;;  %p1200_p13 = scmp.lt.s32.totalorder %s1194_s29, %s1194_s29 }
  0x1d   :  { %p1201_p0 = por %p1200_p13, %p1199_p12 }
  0x1f   :  { %p1202_p1 = pnand %p1201_p0, %p1195_p11 }
  0x21   :  { %1205 = shalt.err (!%p1202_p1)
}
  0x22   :  { %27 = dma.hbm_to_vmem [thread:$0]  %s1510_s0, 256, %s1312_s30, [#allocation3], %s1258_s17, %s1258_s17, %s1259_s18  }
  0x23   :  { %s1260_s9 = smov [#allocation7]   ;;  %s1206_s13 = scalar_lea.hbm %s1516_s6, 512 }
  0x24   :  { %s53_s10 = sshll.u32 %s1260_s9, 4  ;;  %p1207_p2 = scmp.ne.s32.totalorder %s1516_s6, %s1206_s13  ;;  %s54_s10 = int_to_ptr.vmem [resolvable:$true] %s53_s10 }
  0x25   :  { %p1210_p3 = scmp.lt.u32.totalorder %s1206_s13, %s1516_s6 }
  0x27   :  { %p1212_p4 = pnand %p1210_p3, %p1207_p2 }
  0x29   :  { %1215 = shalt.err (!%p1212_p4)
}
  0x2a   :  { %s1216_s20 = scalar_lea.vmem %s54_s10, 512  ;;  %p1221_p6 = scmp.lt.s32.totalorder %s54_s10, %s54_s10 }
  0x2b   :  { %p1217_p5 = scmp.ne.s32.totalorder %s54_s10, %s1216_s20  ;;  %p1222_p7 = scmp.lt.s32.totalorder %s1216_s20, %s1216_s20 }
  0x2d   :  { %p1223_p8 = por %p1222_p7, %p1221_p6 }
  0x2f   :  { %p1224_p9 = pnand %p1223_p8, %p1217_p5 }
  0x31   :  { %1227 = shalt.err (!%p1224_p9)
}
  0x32   :  { %59 = dma.hbm_to_vmem [thread:$0]  %s1516_s6, 512, %s54_s10, [#allocation6], %s1258_s17, %s1258_s17, %s1259_s18  }
  0x33   :  { %1250 = dma.done.wait [#allocation3], 256  }
  0x34   :  { %1251 = vsyncadd [#allocation3], 4294967040 }
  0x35   :  { %1252 = dma.done.wait [#allocation6], 768  }
  0x36   :  { %1253 = vsyncadd [#allocation6], 4294966528  ;;  %vm79_vm0 = vcmask 261120   ;;  %v75_v0 = vld [vmem:[%s1512_s2] sm:$0xff]  ;;  %v76_v1 = vld [vmem:[%s1512_s2 + $0x8] sm:$0xff]  ;;  %vm256_vm3 = vcmask 130048  }
  0x37   :  { %v77_v2 = vld [vmem:[%s1512_s2 + $0x10] sm:$0xff]  ;;  %v1043_v3 = vpack.c.bf16 %v76_v1, %v75_v0  ;;  %v78_v4 = vld [vmem:[%s1512_s2 + $0x18] sm:$0xff]  ;;  %v1376_v5 = vld [vmem:[#allocation2] sm:$0xff]  ;;  %s1261_s2 = smov 96   ;;  %s1262_s29 = smov 64   ;;  %vm561_vm5 = vcmask 523264  }
  0x38   :  { %v1047_v6 = vpack.c.bf16 %v78_v4, %v77_v2  ;;  %974 = vmatprep.mubr.msk.f32.mxu0 %vm79_vm0, %v1376_v5  ;;  %v1380_v7 = vld [vmem:[#allocation2 + $0x8] sm:$0xff]  ;;  %vm1052_vm1 = vmpackc.low %vm79_vm0, %vm79_vm0  ;;  %v74_v15 = vld [vmem:[#allocation5 + $0x8] sm:$0xff]  ;;  %vm839_vm6 = vcmask 351496   ;;  %vm775_vm7 = vcmask 72720   ;;  %vm807_vm8 = vcmask 269384   ;;  %s1264_s21 = smov 119  }
  0x39   :  { %1044 = vmatprep.subr.bf16.mxu0 %v1043_v3  ;;  %v73_v16 = vld [vmem:[#allocation5] sm:$0xff]  ;;  %vm253_vm2 = vcmp.gt.f32.partialorder %v74_v15, 0.5  ;;  %v366_v35 = vld [vmem:[%s1513_s3] sm:$0xff]  ;;  %v367_v36 = vld [vmem:[%s1513_s3 + $0x8] sm:$0xff]  ;;  %s1265_s22 = smov 95   ;;  %vm796_vm9 = vcmask 56320  }
  0x3a   :  { %1046 = vmatpush3.bf16.msra.mxu0 %v1043_v3  ;;  %vm252_vm4 = vcmp.gt.f32.partialorder %v73_v16, 0.5  ;;  %v368_v37 = vld [vmem:[%s1513_s3 + $0x10] sm:$0xff]  ;;  %v1061_v38 = vpack.c.bf16 %v367_v36, %v366_v35  ;;  %v369_v39 = vld [vmem:[%s1513_s3 + $0x18] sm:$0xff]  ;;  %v458_v51 = vld [vmem:[%s1514_s4] sm:$0xff]  ;;  %vm828_vm10 = vcmask 195584   ;;  %vm860_vm11 = vcmask 80896  }
  0x3b   :  { %1048 = vmatprep.subr.bf16.mxu0 %v1047_v6  ;;  %v1065_v40 = vpack.c.bf16 %v369_v39, %v368_v37  ;;  %v459_v52 = vld [vmem:[%s1514_s4 + $0x8] sm:$0xff]  ;;  %v460_v56 = vld [vmem:[%s1514_s4 + $0x10] sm:$0xff]  ;;  %v461_v57 = vld [vmem:[%s1514_s4 + $0x18] sm:$0xff]  ;;  %vm871_vm12 = vcmask 15360   ;;  %vm874_vm13 = vcmask 72704   ;;  %vm877_vm14 = vcmask 269312  }
  0x3c   :  { %v1069_v53 = vpack.c.bf16 %v459_v52, %v458_v51  ;;  %v1073_v58 = vpack.c.bf16 %v461_v57, %v460_v56  ;;  %v549_v59 = vld [vmem:[%s1515_s5] sm:$0xff]  ;;  %v550_v60 = vld [vmem:[%s1515_s5 + $0x8] sm:$0xff]  ;;  %v551_v61 = vld [vmem:[%s1515_s5 + $0x10] sm:$0xff]  ;;  %vm880_vm15 = vcmask 351232   ;;  %s1266_s23 = smov [#allocation8]  }
  0x3d   :  { %v1077_v62 = vpack.c.bf16 %v550_v60, %v549_v59  ;;  %v552_v63 = vld [vmem:[%s1515_s5 + $0x18] sm:$0xff]  ;;  %v553_v1 = vld [vmem:[%s1515_s5 + $0x20] sm:$0xff]  ;;  %v554_v2 = vld [vmem:[%s1515_s5 + $0x28] sm:$0xff]  ;;  %s890_s24 = sshll.u32 %s1266_s23, 4  ;;  %s891_s24 = int_to_ptr.vmem [resolvable:$true] %s890_s24 }
  0x3e   :  { %1050 = vmatpush3.bf16.msra.mxu0 %v1047_v6  ;;  %v1081_v0 = vpack.c.bf16 %v552_v63, %v551_v61  ;;  %v1085_v3 = vpack.c.bf16 %v554_v2, %v553_v1  ;;  %v684_v37 = vld [vmem:[#allocation7] sm:$0xff]  ;;  %s1228_s25 = scalar_lea.vmem %s891_s24, 256  ;;  %p1233_p11 = scmp.lt.s32.totalorder %s891_s24, %s891_s24 }
  0x3f   :  { %v920_v52 = vld [vmem:[%s1517_s7 + $0x3] ss:$0 sm:$0xff]  ;;  %v921_v59 = vld [vmem:[%s1517_s7 + $0x4] ss:$0 sm:$0xff]  ;;  %p1229_p10 = scmp.ne.s32.totalorder %s891_s24, %s1228_s25  ;;  %p1234_p12 = scmp.lt.s32.totalorder %s1228_s25, %s1228_s25 }
  0x41   :  { %975 = vmatmul.mubr.msk.f32.vlgmr.msra.gmra.mrb[0].mxu0 %vm79_vm0, %v1380_v7  ;;  %p1235_p13 = por %p1234_p12, %p1233_p11 }
  0x43   :  { %p1236_p0 = pnand %p1235_p13, %p1229_p10 }
 0x114   :  { %v976_v8 = vpop.f32.mrb[0].mxu0 }
 0x115   :  { %v152_v9 = vpop.f32.mrb[1].mxu0 }
 0x116   :  { %v1117_v10 = vpack.i.bf16 %v976_v8, %v152_v9  ;;  %981 = vmatprep.mubr.msk.f32.mxu1 %vm79_vm0, %v152_v9 }
 0x118   :  { %1113 = vrot.lane.b32.xlu0 %v1117_v10, %s1261_s2 }
 0x18a   :  { %v1114_v11 = vpop.permute.xlu0 %1113 }
 0x18b   :  { %v1116_v12 = vunpack.i.h.bf16 %v1114_v11  ;;  %v1115_v13 = vunpack.i.l.bf16 %v1114_v11  ;;  %v556_v11 = vld [vmem:[%s1515_s5 + $0x38] sm:$0xff] }
 0x18d   :  { %v1051_v14 = vpack.c.bf16 %v1116_v12, %v1115_v13 }
 0x18f   :  { %1053 = vmatprep.subr.msk.bf16.mxu1 %vm1052_vm1, %v1051_v14 }
 0x190   :  { %1056 = vmatpush3.bf16.xpose.msk.msra.mxu1 %vm1052_vm1, %v1051_v14 }
 0x191   :  { %1062 = vmatprep.subr.bf16.mxu1 %v1061_v38 }
 0x197   :  { %982 = vmatmul.mubr.msk.f32.vlgmr.msra.gmra.mrb[0].mxu1 %vm79_vm0, %v976_v8 }
 0x198   :  { %1064 = vmatpush3.bf16.msra.mxu1 %v1061_v38  ;;  %v685_v38 = vld [vmem:[#allocation7 + $0x8] sm:$0xff] }
 0x199   :  { %1066 = vmatprep.subr.bf16.mxu1 %v1065_v40  ;;  %v1093_v39 = vpack.c.bf16 %v685_v38, %v684_v37 }
 0x19c   :  { %1068 = vmatpush3.bf16.msra.mxu1 %v1065_v40  ;;  %v686_v40 = vld [vmem:[#allocation7 + $0x10] sm:$0xff] }
 0x19d   :  { %1078 = vmatprep.subr.bf16.mxu1 %v1077_v62 }
 0x26a   :  { %v983_v17 = vpop.f32.mrb[0].mxu1 }
 0x26b   :  { %v251_v18 = vmul.f32 0.17677669, %v983_v17  ;;  %v241_v19 = vpop.f32.mrb[1].mxu1 }
 0x26c   :  { %v250_v20 = vmul.f32 0.17677669, %v241_v19 }
 0x26d   :  { %v255_v21 = vsel %vm253_vm2, %v251_v18, -1e+09  ;;  %v916_v18 = vld [vmem:[%s1517_s7 + $0x1] ss:$0 sm:$0xff] }
 0x26e   :  { %v260_v22 = vsel %vm256_vm3, %v255_v21, -inf  ;;  %v254_v23 = vsel %vm252_vm4, %v250_v20, -1e+09 }
 0x26f   :  { %261 = vmax.xlane.f32.xlu1 %v260_v22  ;;  %v257_v24 = vsel %vm256_vm3, %v254_v23, -inf }
 0x270   :  { %258 = vmax.xlane.f32.xlu0 %v257_v24 }
 0x2fc   :  { %v262_v25 = vpop.xlane.xlu1 %261 }
 0x2fd   :  { %v264_v26 = vsub.f32 %v255_v21, %v262_v25  ;;  %v259_v27 = vpop.xlane.xlu0 %258 }
 0x2fe   :  { %v263_v28 = vsub.f32 %v254_v23, %v259_v27 }
 0x2ff   :  { %v267_v29 = vmul.f32 1.442695, %v264_v26 }
 0x300   :  { %v265_v30 = vmul.f32 1.442695, %v263_v28 }
 0x301   :  { %1122 = vpow2.f32 %v267_v29 }
 0x302   :  { %1124 = vpow2.f32 %v265_v30 }
 0x30b   :  { %v1123_v31 = vpop.eup %1122 }
 0x30c   :  { %v272_v32 = vsel %vm256_vm3, %v1123_v31, 0.0  ;;  %v1125_v33 = vpop.eup %1124 }
 0x30d   :  { %273 = vadd.xlane.f32.xlu1 %v272_v32  ;;  %v269_v34 = vsel %vm256_vm3, %v1125_v33, 0.0 }
 0x311   :  { %270 = vadd.xlane.f32.xlu1 %v269_v34 }
 0x322   :  { %1118 = vrot.lane.b32.xlu1 %v1117_v10, %s1262_s29  ;;  %v555_v10 = vld [vmem:[%s1515_s5 + $0x30] sm:$0xff] }
 0x323   :  { %v1089_v12 = vpack.c.bf16 %v556_v11, %v555_v10 }
 0x39a   :  { %v274_v41 = vpop.xlane.xlu1 %273 }
 0x39b   :  { %1126 = vrcp.f32 %v274_v41  ;;  %v687_v41 = vld [vmem:[#allocation7 + $0x18] sm:$0xff] }
 0x39e   :  { %v271_v42 = vpop.xlane.xlu1 %270 }
 0x39f   :  { %1128 = vrcp.f32 %v271_v42  ;;  %v1097_v42 = vpack.c.bf16 %v687_v41, %v686_v40 }
 0x3a2   :  { %v1119_v43 = vpop.permute.xlu1 %1118 }
 0x3a3   :  { %v1121_v44 = vunpack.i.h.bf16 %v1119_v43  ;;  %v1120_v45 = vunpack.i.l.bf16 %v1119_v43 }
 0x3a5   :  { %v1057_v46 = vpack.c.bf16 %v1121_v44, %v1120_v45  ;;  %v1127_v47 = vpop.eup %1126 }
 0x3a6   :  { %v278_v50 = vmul.f32 %v1127_v47, %v1123_v31 }
 0x3a7   :  { %1058 = vmatprep.subr.bf16.mxu0 %v1057_v46 }
 0x3a8   :  { %1060 = vmatpush3.bf16.msra.mxu0 %v1057_v46 }
 0x3a9   :  { %v1129_v48 = vpop.eup %1128  ;;  %1070 = vmatprep.subr.bf16.mxu0 %v1069_v53 }
 0x3aa   :  { %v277_v49 = vmul.f32 %v1129_v48, %v1125_v33 }
 0x3ac   :  { %988 = vmatprep.mubr.msk.f32.mxu0 %vm256_vm3, %v277_v49 }
 0x3ad   :  { %989 = vmatmul.mubr.msk.f32.vlgmr.msra.gmra.mrb[2].mxu0 %vm256_vm3, %v278_v50  ;;  %v919_v50 = vld [vmem:[%s1517_s7 + $0x2] ss:$0 sm:$0xff] }
 0x3ae   :  { %1072 = vmatpush3.bf16.msra.mxu0 %v1069_v53 }
 0x3af   :  { %1074 = vmatprep.subr.bf16.mxu0 %v1073_v58 }
 0x3b2   :  { %1076 = vmatpush3.bf16.msra.mxu0 %v1073_v58 }
 0x3b3   :  { %1094 = vmatprep.subr.bf16.mxu0 %v1093_v39 }
 0x480   :  { %v990_v54 = vpop.f32.mrb[2].mxu0 }
 0x481   :  { %v357_v55 = vpop.f32.mrb[3].mxu0 }
 0x482   :  { %999 = vmatprep.mubr.msk.f32.mxu1 %vm79_vm0, %v357_v55 }
 0x483   :  { %1000 = vmatmul.mubr.msk.f32.vlgmr.msra.gmra.mrb[2].mxu1 %vm79_vm0, %v990_v54 }
 0x484   :  { %1080 = vmatpush3.bf16.msra.mxu1 %v1077_v62 }
 0x485   :  { %1082 = vmatprep.subr.bf16.mxu1 %v1081_v0 }
 0x488   :  { %1084 = vmatpush3.bf16.msra.mxu1 %v1081_v0 }
 0x489   :  { %1086 = vmatprep.subr.bf16.mxu1 %v1085_v3 }
 0x48c   :  { %1088 = vmatpush3.bf16.msra.mxu1 %v1085_v3 }
 0x48d   :  { %1090 = vmatprep.subr.bf16.mxu1 %v1089_v12 }
 0x490   :  { %1092 = vmatpush3.bf16.msra.mxu1 %v1089_v12 }
 0x556   :  { %v1001_v4 = vpop.f32.mrb[2].mxu1 }
 0x557   :  { %v442_v6 = vpop.f32.mrb[3].mxu1  ;;  %v452_v9 = vadd.f32 %v1001_v4, %v1380_v7 }
 0x558   :  { %v451_v8 = vadd.f32 %v442_v6, %v1376_v5  ;;  %v913_v5 = vld [vmem:[%s1517_s7] ss:$0 sm:$0xff]  ;;  %s1263_s7 = smov 126  }
 0x55a   :  { %1010 = vmatprep.mubr.msk.f32.mxu0 %vm79_vm0, %v451_v8 }
 0x55b   :  { %1011 = vmatmul.mubr.msk.f32.vlgmr.msra.gmra.mrb[4].mxu0 %vm79_vm0, %v452_v9 }
 0x55c   :  { %1096 = vmatpush3.bf16.msra.mxu0 %v1093_v39 }
 0x55d   :  { %1098 = vmatprep.subr.bf16.mxu0 %v1097_v42 }
 0x560   :  { %1100 = vmatpush3.bf16.msra.mxu0 %v1097_v42 }
 0x62e   :  { %v1012_v7 = vpop.f32.mrb[4].mxu0 }
 0x62f   :  { %v544_v13 = vadd.f32 %v1012_v7, %v913_v5  ;;  %v538_v14 = vpop.f32.mrb[5].mxu0 }
 0x630   :  { %v539_v15 = vadd.f32 %v913_v5, %v538_v14 }
 0x631   :  { %v548_v17 = vmax.f32 %v544_v13, 0.0 }
 0x632   :  { %v547_v16 = vmax.f32 %v539_v15, 0.0 }
 0x634   :  { %1029 = vmatprep.mubr.msk.f32.mxu1 %vm561_vm5, %v547_v16 }
 0x635   :  { %1030 = vmatmul.mubr.msk.f32.vlgmr.msra.gmra.mrb[4].mxu1 %vm561_vm5, %v548_v17 }
 0x708   :  { %v1031_v19 = vpop.f32.mrb[4].mxu1 }
 0x709   :  { %v640_v20 = vadd.f32 %v1031_v19, %v916_v18  ;;  %v634_v21 = vpop.f32.mrb[5].mxu1 }
 0x70a   :  { %v635_v22 = vadd.f32 %v916_v18, %v634_v21 }
 0x70b   :  { %v644_v23 = vadd.f32 %v640_v20, %v452_v9 }
 0x70c   :  { %v643_v24 = vadd.f32 %v635_v22, %v451_v8 }
 0x70d   :  { %v648_v25 = vsel %vm79_vm0, %v644_v23, 0.0 }
 0x70e   :  { %649 = vadd.xlane.f32.xlu0 %v648_v25  ;;  %v645_v26 = vsel %vm79_vm0, %v643_v24, 0.0 }
 0x70f   :  { %646 = vadd.xlane.f32.xlu1 %v645_v26 }
 0x79b   :  { %v650_v27 = vpop.xlane.xlu0 %649 }
 0x79c   :  { %v653_v28 = vmul.f32 0.03125, %v650_v27  ;;  %v647_v29 = vpop.xlane.xlu1 %646 }
 0x79d   :  { %v652_v30 = vmul.f32 0.03125, %v647_v29 }
 0x79e   :  { %v655_v31 = vsub.f32 %v644_v23, %v653_v28 }
 0x79f   :  { %v654_v32 = vsub.f32 %v643_v24, %v652_v30 }
 0x7a0   :  { %v657_v35 = vmul.f32 %v655_v31, %v655_v31 }
 0x7a1   :  { %v656_v33 = vmul.f32 %v654_v32, %v654_v32 }
 0x7a2   :  { %v661_v36 = vsel %vm79_vm0, %v657_v35, 0.0 }
 0x7a3   :  { %v658_v34 = vsel %vm79_vm0, %v656_v33, 0.0 }
 0x7a4   :  { %659 = vadd.xlane.f32.xlu0 %v658_v34 }
 0x7a8   :  { %662 = vadd.xlane.f32.xlu0 %v661_v36 }
 0x831   :  { %v660_v43 = vpop.xlane.xlu0 %659 }
 0x832   :  { %v664_v44 = vmul.f32 0.03125, %v660_v43 }
 0x834   :  { %v666_v45 = vadd.f32 1e-05, %v664_v44 }
 0x835   :  { %v663_v46 = vpop.xlane.xlu0 %662 }
 0x836   :  { %1130 = vrsqrt.f32 %v666_v45  ;;  %v665_v47 = vmul.f32 0.03125, %v663_v46 }
 0x838   :  { %v667_v48 = vadd.f32 1e-05, %v665_v47 }
 0x83a   :  { %1132 = vrsqrt.f32 %v667_v48 }
 0x840   :  { %v1131_v49 = vpop.eup %1130 }
 0x841   :  { %v670_v51 = vmul.f32 %v1131_v49, %v654_v32 }
 0x843   :  { %v676_v53 = vmul.f32 %v919_v50, %v670_v51 }
 0x844   :  { %v1133_v54 = vpop.eup %1132 }
 0x845   :  { %v671_v55 = vmul.f32 %v1133_v54, %v655_v31  ;;  %v682_v56 = vadd.f32 %v920_v52, %v676_v53 }
 0x847   :  { %v677_v57 = vmul.f32 %v919_v50, %v671_v55  ;;  %1040 = vmatprep.mubr.msk.f32.mxu0 %vm79_vm0, %v682_v56 }
 0x849   :  { %v683_v58 = vadd.f32 %v920_v52, %v677_v57 }
 0x84b   :  { %1041 = vmatmul.mubr.msk.f32.vlgmr.msra.gmra.mrb[6].mxu0 %vm79_vm0, %v683_v58 }
 0x91e   :  { %v1042_v60 = vpop.f32.mrb[6].mxu0 }
 0x91f   :  { %v1469_v61 = vadd.f32 %v1042_v60, %v921_v59  ;;  %v764_v62 = vpop.f32.mrb[7].mxu0 }
 0x920   :  { %v1474_v1 = vadd.f32 %v921_v59, %v764_v62 }
 0x921   :  { %v843_v63 = vsel %vm839_vm6, %v1469_v61, -inf  ;;  %v779_v0 = vsel %vm775_vm7, %v1469_v61, -inf  ;;  %v811_v2 = vsel %vm807_vm8, %v1469_v61, -inf }
 0x922   :  { %844 = vmax.xlane.f32.xlu1 %v843_v63  ;;  %780 = vmax.xlane.f32.xlu0 %v779_v0  ;;  %v776_v3 = vsel %vm775_vm7, %v1474_v1, -inf  ;;  %v808_v4 = vsel %vm807_vm8, %v1474_v1, -inf  ;;  %v840_v6 = vsel %vm839_vm6, %v1474_v1, -inf }
 0x926   :  { %812 = vmax.xlane.f32.xlu0 %v811_v2 }
 0x92a   :  { %777 = vmax.xlane.f32.xlu0 %v776_v3 }
 0x92e   :  { %809 = vmax.xlane.f32.xlu0 %v808_v4 }
 0x932   :  { %841 = vmax.xlane.f32.xlu0 %v840_v6 }
 0x9af   :  { %v781_v8 = vpop.xlane.xlu0 %780  ;;  %v845_v12 = vpop.xlane.xlu1 %844 }
 0x9b0   :  { %v783_v9 = vsub.f32 %v1469_v61, %v781_v8  ;;  %v847_v13 = vsub.f32 %v1469_v61, %v845_v12 }
 0x9b2   :  { %v786_v10 = vmul.f32 1.442695, %v783_v9  ;;  %v850_v17 = vmul.f32 1.442695, %v847_v13 }
 0x9b3   :  { %v813_v11 = vpop.xlane.xlu0 %812 }
 0x9b4   :  { %v815_v5 = vsub.f32 %v1469_v61, %v813_v11  ;;  %1134 = vpow2.f32 %v786_v10 }
 0x9b6   :  { %v818_v7 = vmul.f32 1.442695, %v815_v5 }
 0x9b7   :  { %v778_v14 = vpop.xlane.xlu0 %777 }
 0x9b8   :  { %1136 = vpow2.f32 %v818_v7  ;;  %v782_v15 = vsub.f32 %v1474_v1, %v778_v14 }
 0x9ba   :  { %v784_v16 = vmul.f32 1.442695, %v782_v15 }
 0x9bb   :  { %v810_v18 = vpop.xlane.xlu0 %809 }
 0x9bc   :  { %1138 = vpow2.f32 %v784_v16  ;;  %v814_v19 = vsub.f32 %v1474_v1, %v810_v18 }
 0x9bd   :  { %1140 = vpow2.f32 %v850_v17 }
 0x9be   :  { %v816_v20 = vmul.f32 1.442695, %v814_v19  ;;  %v1135_v21 = vpop.eup %1134 }
 0x9bf   :  { %v842_v22 = vpop.xlane.xlu0 %841  ;;  %792 = vrot.lane.b32.xlu1 %v1135_v21, %s1263_s7 }
 0x9c0   :  { %1142 = vpow2.f32 %v816_v20  ;;  %v846_v23 = vsub.f32 %v1474_v1, %v842_v22 }
 0x9c2   :  { %v1137_v24 = vpop.eup %1136  ;;  %v848_v25 = vmul.f32 1.442695, %v846_v23 }
 0x9c3   :  { %824 = vrot.lane.b32.xlu0 %v1137_v24, %s1264_s21 }
 0x9c4   :  { %1144 = vpow2.f32 %v848_v25 }
 0x9c6   :  { %v1139_v26 = vpop.eup %1138 }
 0x9c7   :  { %790 = vrot.lane.b32.xlu0 %v1139_v26, %s1263_s7  ;;  %v1141_v27 = vpop.eup %1140 }
 0x9ca   :  { %v1143_v28 = vpop.eup %1142 }
 0x9cb   :  { %856 = vrot.lane.b32.xlu0 %v1141_v27, %s1265_s22  ;;  %822 = vrot.lane.b32.xlu1 %v1143_v28, %s1264_s21 }
 0x9ce   :  { %v1145_v29 = vpop.eup %1144 }
 0x9cf   :  { %854 = vrot.lane.b32.xlu1 %v1145_v29, %s1265_s22 }
 0xa31   :  { %v793_v30 = vpop.permute.xlu1 %792 }
 0xa32   :  { %v800_v31 = vsel %vm796_vm9, %v793_v30, 0.0 }
 0xa33   :  { %801 = vadd.xlane.f32.xlu0 %v800_v31 }
 0xa35   :  { %v825_v32 = vpop.permute.xlu0 %824 }
 0xa36   :  { %v832_v33 = vsel %vm828_vm10, %v825_v32, 0.0 }
 0xa37   :  { %833 = vadd.xlane.f32.xlu1 %v832_v33 }
 0xa39   :  { %v791_v34 = vpop.permute.xlu0 %790 }
 0xa3a   :  { %v797_v35 = vsel %vm796_vm9, %v791_v34, 0.0 }
 0xa3b   :  { %798 = vadd.xlane.f32.xlu1 %v797_v35 }
 0xa3d   :  { %v823_v36 = vpop.permute.xlu1 %822  ;;  %v857_v37 = vpop.permute.xlu0 %856 }
 0xa3e   :  { %v829_v38 = vsel %vm828_vm10, %v823_v36, 0.0  ;;  %v864_v39 = vsel %vm860_vm11, %v857_v37, 0.0 }
 0xa3f   :  { %830 = vadd.xlane.f32.xlu0 %v829_v38  ;;  %865 = vadd.xlane.f32.xlu1 %v864_v39 }
 0xa41   :  { %v855_v40 = vpop.permute.xlu1 %854 }
 0xa42   :  { %v861_v41 = vsel %vm860_vm11, %v855_v40, 0.0 }
 0xa43   :  { %862 = vadd.xlane.f32.xlu0 %v861_v41 }
 0xac0   :  { %v802_v42 = vpop.xlane.xlu0 %801 }
 0xac1   :  { %1146 = vrcp.f32 %v802_v42 }
 0xac4   :  { %v834_v43 = vpop.xlane.xlu1 %833 }
 0xac5   :  { %1148 = vrcp.f32 %v834_v43 }
 0xac8   :  { %v799_v44 = vpop.xlane.xlu1 %798 }
 0xac9   :  { %1150 = vrcp.f32 %v799_v44 }
 0xaca   :  { %1152 = vtanh.f32 %v1469_v61 }
 0xacb   :  { %v1147_v48 = vpop.eup %1146 }
 0xacc   :  { %v866_v45 = vpop.xlane.xlu1 %865  ;;  %v831_v46 = vpop.xlane.xlu0 %830  ;;  %v806_v50 = vmul.f32 %v1147_v48, %v1135_v21 }
 0xacd   :  { %1154 = vrcp.f32 %v866_v45 }
 0xace   :  { %1156 = vrcp.f32 %v831_v46 }
 0xacf   :  { %1158 = vtanh.f32 %v1474_v1  ;;  %v1149_v49 = vpop.eup %1148 }
 0xad0   :  { %v863_v47 = vpop.xlane.xlu0 %862  ;;  %v838_v52 = vmul.f32 %v1149_v49, %v1137_v24 }
 0xad1   :  { %1160 = vrcp.f32 %v863_v47 }
 0xad3   :  { %v1151_v51 = vpop.eup %1150 }
 0xad4   :  { %v1153_v53 = vpop.eup %1152  ;;  %v805_v56 = vmul.f32 %v1151_v51, %v1139_v26 }
 0xad5   :  { %v873_v58 = vsel %vm871_vm12, %v1153_v53, %v806_v50 }
 0xad6   :  { %v876_v60 = vsel %vm874_vm13, %v873_v58, %v838_v52 }
 0xad7   :  { %v1155_v54 = vpop.eup %1154 }
 0xad8   :  { %v1157_v55 = vpop.eup %1156  ;;  %v870_v57 = vmul.f32 %v1155_v54, %v1141_v27 }
 0xad9   :  { %v837_v59 = vmul.f32 %v1157_v55, %v1143_v28  ;;  %v1159_v61 = vpop.eup %1158 }
 0xada   :  { %v879_v62 = vsel %vm877_vm14, %v876_v60, %v870_v57  ;;  %v872_v2 = vsel %vm871_vm12, %v1159_v61, %v805_v56 }
 0xadb   :  { %v1161_v63 = vpop.eup %1160  ;;  %v882_v0 = vsel %vm880_vm15, %v879_v62, 0.0  ;;  %v875_v3 = vsel %vm874_vm13, %v872_v2, %v837_v59 }
 0xadc   :  { %v869_v1 = vmul.f32 %v1161_v63, %v1145_v29  ;;  %884 = vst [vmem:[#allocation8 + $0x8] sm:$0xff] %v882_v0 }
 0xade   :  { %v878_v4 = vsel %vm877_vm14, %v875_v3, %v869_v1 }
 0xadf   :  { %v881_v6 = vsel %vm880_vm15, %v878_v4, 0.0 }
 0xae0   :  { %883 = vst [vmem:[#allocation8] sm:$0xff] %v881_v6 }
 0xae1   :  { %1239 = shalt.err (!%p1236_p0)
}
 0xae2   :  { %s1240_s6 = scalar_lea.hbm %s1518_s8, 256 }
 0xae3   :  { %p1241_p1 = scmp.ne.s32.totalorder %s1518_s8, %s1240_s6  ;;  %p1244_p2 = scmp.lt.u32.totalorder %s1240_s6, %s1518_s8 }
 0xae5   :  { %p1246_p3 = pnand %p1244_p2, %p1241_p1 }
 0xae7   :  { %1249 = shalt.err (!%p1246_p3)
}
 0xae8   :  { %896 = dma.vmem_to_hbm [thread:$0]  %s891_s24, 256, %s1518_s8, [#allocation4], %s1258_s17, %s1258_s17, %s1259_s18  }
 0xae9   :  { %1254 = dma.done.wait [#allocation4], 256  }
 0xaea   :  { %1255 = vsyncadd [#allocation4], 4294967040 }
 0xaeb   :  { %900 = vsyncpa [#allocation3], 1 }
 0xaec   :  { %901 = vsyncpa [#allocation6], 1 }
 0xaed   :  { %902 = vsyncpa [#allocation4], 1 }

</bundles_post_ra>
